<compile_context>
chip_gen: v7x
topology: tpu7x:2x2x1
jax: 0.10.0
libtpu: 0.0.40
codegen_flags: <defaults>
</compile_context>

<pallas_src>
import functools

import jax
import jax.numpy as jnp
from jax.experimental import pallas as pl
from jax.experimental.pallas import tpu as pltpu

_LANES = 128          # lane (last) dim of every tile
_MIN_ROWS = 16        # keep rows a multiple of 16 (bf16 packs 16 sublanes/vreg)
_TARGET_BLK_ROWS = 2048  # 2048 x 128 x 4B = 1 MiB per f32 block


def _round_up(x: int, m: int) -> int:
    return ((x + m - 1) // m) * m


def _make_gan_loss_kernel(use_least_squares: bool, is_tgt_real: bool):
    """Kernel: accumulate per-element GAN loss of the current (BLK_ROWS, 128)
    tile into the (8, 128) output block (resident in VMEM across the
    reduction axis)."""

    def kernel(x_ref, acc_ref):
        t = pl.program_id(1)

        @pl.when(t == 0)
        def _():
            acc_ref[...] = jnp.zeros_like(acc_ref)

        # Native-dtype load, f32 math.
        x = x_ref[...].astype(jnp.float32)

        if use_least_squares:
            # MSELoss against constant label (1.0 real / 0.0 fake).
            tgt = 1.0 if is_tgt_real else 0.0
            d = x - tgt
            per = d * d
        else:
            # BCELoss against constant label, PyTorch log clamp at -100
            # (each per-element loss term capped at 100).
            if is_tgt_real:
                per = jnp.minimum(-jnp.log(x), 100.0)
            else:
                per = jnp.minimum(-jnp.log(1.0 - x), 100.0)

        # Fold (BLK_ROWS, 128) -> (8, 128) with plain VPU adds (no XLU reduce,
        # no sub-lane store). Reshape is vreg-tile aligned -> free.
        blk_rows = per.shape[0]
        acc_ref[...] += per.reshape(blk_rows // 8, 8, _LANES).sum(axis=0)

    return kernel


@functools.partial(jax.jit, static_argnames=("is_tgt_real", "use_least_squares"))
def gan_loss(input_, is_tgt_real: bool, use_least_squares: bool = False):
    """GANLoss.__call__(input_, is_tgt_real) -> scalar loss (f32)."""
    n = input_.size
    flat = input_.reshape(-1)  # keep native dtype (bf16 streams as bf16)

    rows = pl.cdiv(n, _LANES)
    blk_rows = min(_TARGET_BLK_ROWS, _round_up(max(rows, _MIN_ROWS), _MIN_ROWS))
    tiles = pl.cdiv(rows, blk_rows)

    # Outer parallel axis: lets v7x megacore split the stream (harmless
    # serial loop on single-TC chips).
    n_par = 2 if tiles >= 2 else 1
    tiles_per_core = pl.cdiv(tiles, n_par)
    total_tiles = n_par * tiles_per_core
    padded_rows = total_tiles * blk_rows
    padded = padded_rows * _LANES

    if padded != n:
        # Pad with the target value: contributes exactly zero loss for both
        # MSE and BCE, so no in-kernel mask is needed. Divisor stays n.
        pad_val = 1.0 if is_tgt_real else 0.0
        flat = jnp.pad(flat, (0, padded - n), constant_values=pad_val)

    x2 = flat.reshape(padded_rows, _LANES)

    kernel = _make_gan_loss_kernel(use_least_squares, is_tgt_real)

    partials = pl.pallas_call(
        kernel,
        out_shape=jax.ShapeDtypeStruct((n_par * 8, _LANES), jnp.float32),
        grid=(n_par, tiles_per_core),
        in_specs=[
            pl.BlockSpec(
                (blk_rows, _LANES),
                lambda p, t, _tpc=tiles_per_core: (p * _tpc + t, 0),
            )
        ],
        out_specs=pl.BlockSpec((8, _LANES), lambda p, t: (p, 0)),
        compiler_params=pltpu.CompilerParams(
            dimension_semantics=("parallel", "arbitrary")),
    )(x2)

    # Final tiny reduction (at most 16x128 f32) + mean divide in the wrapper.
    return jnp.sum(partials) / jnp.float32(n)


class GANLossPallas:
    """Mirror of the PyTorch GANLoss module (callable, not .forward)."""

    def __init__(self, use_least_squares: bool = False):
        self.use_least_squares = use_least_squares

    def __call__(self, input_, is_tgt_real: bool):
        return gan_loss(input_, bool(is_tgt_real),
                        use_least_squares=self.use_least_squares)


def _reference(x, is_tgt_real, use_least_squares):
    x = x.astype(jnp.float32)
    if use_least_squares:
        tgt = 1.0 if is_tgt_real else 0.0
        return jnp.mean((x - tgt) ** 2)
    if is_tgt_real:
        per = jnp.minimum(-jnp.log(x), 100.0)
    else:
        per = jnp.minimum(-jnp.log(1.0 - x), 100.0)
    return jnp.mean(per)


if __name__ == "__main__":
    key = jax.random.PRNGKey(0)

    # Discriminator output: probabilities in (0, 1), NCHW shape (2, 4, 16, 16).
    logits = jax.random.normal(key, (2, 4, 16, 16), dtype=jnp.float32)
    probs_f32 = jax.nn.sigmoid(logits)

    # Second case: unaligned element count + native bf16 (exercises the
    # target-value padding path and the in-kernel cast).
    key2 = jax.random.split(key, 2)[1]
    probs_bf16 = jax.nn.sigmoid(
        jax.random.normal(key2, (3, 5, 7, 11), dtype=jnp.float32)
    ).astype(jnp.bfloat16)

    ok = True
    for x in (probs_f32, probs_bf16):
        for use_ls in (False, True):
            loss_mod = GANLossPallas(use_least_squares=use_ls)
            for is_real in (True, False):
                out = jax.block_until_ready(loss_mod(x, is_real))
                ref = _reference(x, is_real, use_ls)
                if not jnp.allclose(out, ref, rtol=1e-5, atol=1e-5):
                    ok = False
                    print("MISMATCH", str(x.dtype), tuple(x.shape), use_ls,
                          is_real, float(out), float(ref))

    if ok:
        print("KERNEL_OK")
</pallas_src>

<mosaic_0001>
module attributes {stable_mosaic.version = 11 : i64} {
  func.func @kernel(%arg0: i32, %arg1: i32, %arg2: memref<16x128xf32, #tpu.memory_space<vmem>>, %arg3: memref<8x128xf32, #tpu.memory_space<vmem>>) attributes {dimension_semantics = [#tpu.dimension_semantics<parallel>, #tpu.dimension_semantics<arbitrary>], iteration_bounds = array<i64: 1, 1>, scalar_prefetch = 0 : i64, scratch_operands = 0 : i64, tpu.core_type = #tpu.core_type<tc>, window_params = [{transform_indices = @transform_0, window_bounds = array<i64: 16, 128>}, {transform_indices = @transform_1, window_bounds = array<i64: 8, 128>}]} {
    %c0_i32 = arith.constant 0 : i32
    %0 = arith.cmpi eq, %arg1, %c0_i32 : i32
    %1 = arith.extui %0 : i1 to i32
    %c0_i32_0 = arith.constant 0 : i32
    %2 = arith.cmpi ne, %1, %c0_i32_0 : i32
    scf.if %2 {
      %cst_8 = arith.constant 0.000000e+00 : f32
      %14 = vector.broadcast %cst_8 : f32 to vector<8x128xf32>
      %c0_9 = arith.constant 0 : index
      %c0_10 = arith.constant 0 : index
      %15 = vector.load %arg3[%c0_9, %c0_10] : memref<8x128xf32, #tpu.memory_space<vmem>>, vector<8x128xf32>
      tpu.vector_store %arg3[%c0_9, %c0_10], %14 {strides = array<i32>} : memref<8x128xf32, #tpu.memory_space<vmem>>, vector<8x128xf32>,
    } else {
    }
    %c0 = arith.constant 0 : index
    %c0_1 = arith.constant 0 : index
    %3 = vector.load %arg2[%c0, %c0_1] : memref<16x128xf32, #tpu.memory_space<vmem>>, vector<16x128xf32>
    %4 = math.log %3 : vector<16x128xf32>
    %cst = arith.constant 0.000000e+00 : f32
    %5 = vector.broadcast %cst : f32 to vector<16x128xf32>
    %6 = arith.subf %5, %4 : vector<16x128xf32>
    %cst_2 = arith.constant 1.000000e+02 : f32
    %7 = vector.broadcast %cst_2 : f32 to vector<16x128xf32>
    %8 = arith.minimumf %6, %7 : vector<16x128xf32>
    %c0_3 = arith.constant 0 : index
    %c0_4 = arith.constant 0 : index
    %9 = vector.load %arg3[%c0_3, %c0_4] : memref<8x128xf32, #tpu.memory_space<vmem>>, vector<8x128xf32>
    %10 = vector.shape_cast %8 : vector<16x128xf32> to vector<2x8x128xf32>
    %cst_5 = arith.constant dense<0.000000e+00> : vector<8x128xf32>
    %11 = vector.multi_reduction <add>, %10, %cst_5 [0] : vector<2x8x128xf32> to vector<8x128xf32>
    %12 = arith.addf %9, %11 : vector<8x128xf32>
    %c0_6 = arith.constant 0 : index
    %c0_7 = arith.constant 0 : index
    %13 = vector.load %arg3[%c0_6, %c0_7] : memref<8x128xf32, #tpu.memory_space<vmem>>, vector<8x128xf32>
    tpu.vector_store %arg3[%c0_6, %c0_7], %12 {strides = array<i32>} : memref<8x128xf32, #tpu.memory_space<vmem>>, vector<8x128xf32>,
    return
  }
  func.func @transform_0(%arg0: i32, %arg1: i32) -> (i32, i32) {
    %c1_i32 = arith.constant 1 : i32
    %0 = arith.muli %arg0, %c1_i32 : i32
    %1 = arith.addi %0, %arg1 : i32
    %c0_i32 = arith.constant 0 : i32
    %c0_i32_0 = arith.constant 0 : i32
    return %1, %c0_i32 : i32, i32
  }
  func.func @transform_1(%arg0: i32, %arg1: i32) -> (i32, i32) {
    %c0_i32 = arith.constant 0 : i32
    %c0_i32_0 = arith.constant 0 : i32
    return %arg0, %c0_i32 : i32, i32
  }
}

</mosaic_0001>

<bundles_post_ra>
// kernel: gan_loss.1
= control target key start
LH: loop header
LB: loop body
LE: loop exit
PB: predicated region body
PF: predicated region fallthrough
CT: control target
= control target key end

     0   :  { %s83_s0 = inlined_call_operand.vmem [shape: f32[16,128], index: 0, kind: input, shape index: {}]   ;;  %s84_s1 = inlined_call_operand.vmem [shape: f32[8,128], index: 1, kind: output, shape index: {}]  }
   0x1   :  { %v35_v0 = vld [vmem:[%s83_s0] sm:$0xff]  ;;  %v36_v1 = vld [vmem:[%s83_s0 + $0x8] sm:$0xff] }
   0x2   :  { %60 = vlog2.f32 %v35_v0 }
   0x3   :  { %62 = vlog2.f32 %v36_v1 }
   0xc   :  { %v61_v2 = vpop.eup %60 }
   0xd   :  { %v63_v3 = vpop.eup %62  ;;  %v38_v4 = vmul.f32 0.6931472, %v61_v2 }
   0xe   :  { %v40_v5 = vmul.f32 0.6931472, %v63_v3 }
   0xf   :  { %v41_v6 = vsub.f32 0.0, %v38_v4 }
  0x10   :  { %v42_v7 = vsub.f32 0.0, %v40_v5 }
  0x11   :  { %v43_v8 = vmin.f32 %v41_v6, 100.0 }
  0x12   :  { %v44_v9 = vmin.f32 %v42_v7, 100.0 }
  0x14   :  { %v46_v10 = vadd.f32 %v44_v9, %v43_v8 }
  0x16   :  { %48 = vst [vmem:[%s84_s1] sm:$0xff] %v46_v10 }

</bundles_post_ra>
